<compile_context>
chip_gen: v5e
topology: v5e:2x2
jax: 0.10.0
libtpu: 0.0.40
codegen_flags: <defaults>
</compile_context>

<pallas_src>
import functools

import jax
import jax.numpy as jnp
from jax.experimental import pallas as pl
from jax.experimental.pallas import tpu as pltpu


# ------------------------------- Pallas kernel -------------------------------

def _dilated_residual_kernel(x_ref, wd_ref, bd_ref, w1_ref, b1_ref, o_ref, *,
                             dilation):
    """Block: x (NB, C, T) -> out (NB, C, T). Channels on sublanes, time on lanes."""
    nb, _, T = x_ref.shape
    d = dilation

    # Hoisted once per grid step: (1, T) padding masks and the tiny weight tiles.
    t = jax.lax.broadcasted_iota(jnp.int32, (1, T), 1)
    left_mask = (t >= d).astype(jnp.float32)       # zero x[t-d] for t < d
    right_mask = (t < T - d).astype(jnp.float32)   # zero x[t+d] for t >= T-d

    w0 = wd_ref[0]       # (Cout, Cin) bf16, tap applied to x[t-d]
    w1d = wd_ref[1]      # tap applied to x[t]
    w2 = wd_ref[2]       # tap applied to x[t+d]
    bd = bd_ref[...]     # (Cout, 1) f32
    w1 = w1_ref[...]     # (Cout, Cout) bf16
    b1 = b1_ref[...]     # (Cout, 1) f32

    def body(i, carry):
        x_lp = x_ref[i]                            # (C, T) bf16 (HBM I/O dtype)
        lp = x_lp.dtype
        x = x_lp.astype(jnp.float32)               # f32 for roll/mask/residual
        # Time shifts via lane rolls (XLU, ~free) + zero masks == zero padding=d.
        x_left = pltpu.roll(x, shift=d, axis=1) * left_mask
        x_right = pltpu.roll(x, shift=T - d, axis=1) * right_mask
        # Dilated k=3 conv as three accumulating MXU dots (bf16 in, f32 acc).
        h = (jnp.dot(w0, x_left.astype(lp), preferred_element_type=jnp.float32)
             + jnp.dot(w1d, x_lp, preferred_element_type=jnp.float32)
             + jnp.dot(w2, x_right.astype(lp), preferred_element_type=jnp.float32)
             + bd)
        h = jnp.maximum(h, 0.0)                    # ReLU (f32)
        # 1x1 conv (bf16 in, f32 acc), then residual add in f32.
        y = jnp.dot(w1, h.astype(lp), preferred_element_type=jnp.float32) + b1
        # Dropout = identity (eval-mode semantics).
        o_ref[i] = (x + y).astype(o_ref.dtype)
        return carry

    jax.lax.fori_loop(0, nb, body, 0, unroll=True)


# ------------------------------ pallas_call glue ------------------------------

def dilated_residual_forward(params, x_nct, *, dilation,
                             compute_dtype=jnp.bfloat16):
    """x_nct: (N, C, T) -> (N, C, T) in compute_dtype; DilatedResidualLayer fwd."""
    N, C, T = x_nct.shape
    assert T > dilation, "sequence must be longer than the dilation"
    # (T a multiple of 128 keeps stores lane-dense; non-multiples are still
    #  correct, just slower partial stores.)

    w_dil = params["w_dil"]                  # (Cout, Cin, 3)  PyTorch layout
    b_dil = params["b_dil"]                  # (Cout,)
    w_1x1 = params["w_1x1"]                  # (Cout, Cout, 1)
    b_1x1 = params["b_1x1"]                  # (Cout,)
    Cout, Cin, K = w_dil.shape
    assert K == 3 and Cin == C and Cout == C, "residual add needs Cin == Cout"

    # Tap-major (3, Cout, Cin): wd[k] multiplies x[t + (k-1)*dilation].
    wd = jnp.transpose(w_dil, (2, 0, 1)).astype(compute_dtype)
    bd = b_dil.reshape(Cout, 1).astype(jnp.float32)
    w1 = w_1x1[:, :, 0].astype(compute_dtype)
    b1 = b_1x1.reshape(Cout, 1).astype(jnp.float32)
    x_lp = x_nct.astype(compute_dtype)       # bf16 activations in HBM

    # Largest divisor of N whose activation block stays <= ~4 MiB: as few (and
    # as big) grid steps as possible to amortize per-step overhead.
    itemsize = jnp.dtype(compute_dtype).itemsize
    nb_cap = max(1, (4 << 20) // max(1, C * T * itemsize))
    nb = 1
    for cand in range(min(N, nb_cap), 0, -1):
        if N % cand == 0:
            nb = cand
            break

    kernel = functools.partial(_dilated_residual_kernel, dilation=dilation)
    return pl.pallas_call(
        kernel,
        out_shape=jax.ShapeDtypeStruct((N, C, T), compute_dtype),
        grid=(N // nb,),
        in_specs=[
            pl.BlockSpec((nb, C, T), lambda n: (n, 0, 0)),   # activations
            pl.BlockSpec((3, C, C), lambda n: (0, 0, 0)),    # dilated tap weights
            pl.BlockSpec((C, 1), lambda n: (0, 0)),          # dilated bias
            pl.BlockSpec((C, C), lambda n: (0, 0)),          # 1x1 weights
            pl.BlockSpec((C, 1), lambda n: (0, 0)),          # 1x1 bias
        ],
        out_specs=pl.BlockSpec((nb, C, T), lambda n: (n, 0, 0)),
        compiler_params=pltpu.CompilerParams(
            dimension_semantics=("parallel",)),
    )(x_lp, wd, bd, w1, b1)


# ---------------------------- pure-JAX reference ----------------------------

def _reference(params, x, dilation, compute_dtype):
    """f32 HIGHEST-precision reference on the same (compute_dtype-rounded) inputs."""
    f32 = jnp.float32
    d = dilation
    w_dil = params["w_dil"].astype(compute_dtype).astype(f32)
    w_1x1 = params["w_1x1"].astype(compute_dtype).astype(f32)
    b_dil = params["b_dil"].astype(f32)
    b_1x1 = params["b_1x1"].astype(f32)
    x = x.astype(compute_dtype).astype(f32)
    h = jax.lax.conv_general_dilated(
        x, w_dil, window_strides=(1,), padding=[(d, d)],
        rhs_dilation=(d,), dimension_numbers=("NCH", "OIH", "NCH"),
        precision=jax.lax.Precision.HIGHEST) + b_dil[None, :, None]
    h = jnp.maximum(h, 0.0)
    y = jax.lax.conv_general_dilated(
        h, w_1x1, window_strides=(1,), padding=[(0, 0)],
        dimension_numbers=("NCH", "OIH", "NCH"),
        precision=jax.lax.Precision.HIGHEST) + b_1x1[None, :, None]
    return x + y


# ----------------------------------- main -----------------------------------

if __name__ == "__main__":
    N, C, T, dilation = 2, 8, 256, 2

    key = jax.random.PRNGKey(0)
    kx, kw1, kb1, kw2, kb2 = jax.random.split(key, 5)

    def u(k, shape, fan_in):
        bound = 1.0 / (fan_in ** 0.5)
        return jax.random.uniform(k, shape, jnp.float32, -bound, bound)

    params = dict(
        w_dil=u(kw1, (C, C, 3), 3 * C),   # PyTorch Conv1d default-init style
        b_dil=u(kb1, (C,), 3 * C),
        w_1x1=u(kw2, (C, C, 1), C),
        b_1x1=u(kb2, (C,), C),
    )
    x = jax.random.normal(kx, (N, C, T), jnp.float32)

    out = jax.block_until_ready(
        dilated_residual_forward(params, x, dilation=dilation))
    assert out.shape == (N, C, T), out.shape
    assert out.dtype == jnp.bfloat16, out.dtype

    ref = jax.block_until_ready(_reference(params, x, dilation, jnp.bfloat16))
    max_err = float(jnp.max(jnp.abs(out.astype(jnp.float32) - ref)))
    # bf16 matmul-input / bf16-output policy vs f32 HIGHEST reference.
    assert max_err < 5e-2, f"kernel/reference mismatch: {max_err}"

    print("KERNEL_OK")
</pallas_src>

<mosaic_0001>
module attributes {stable_mosaic.version = 11 : i64} {
  func.func @_dilated_residual_kernel(%arg0: i32, %arg1: memref<2x8x256xbf16, #tpu.memory_space<vmem>>, %arg2: memref<3x8x8xbf16, #tpu.memory_space<vmem>>, %arg3: memref<8x1xf32, #tpu.memory_space<vmem>>, %arg4: memref<8x8xbf16, #tpu.memory_space<vmem>>, %arg5: memref<8x1xf32, #tpu.memory_space<vmem>>, %arg6: memref<2x8x256xbf16, #tpu.memory_space<vmem>>) attributes {dimension_semantics = [#tpu.dimension_semantics<parallel>], iteration_bounds = array<i64: 1>, scalar_prefetch = 0 : i64, scratch_operands = 0 : i64, tpu.core_type = #tpu.core_type<tc>, window_params = [{transform_indices = @transform_0, window_bounds = array<i64: 2, 8, 256>}, {pipeline_mode = #tpu.pipeline_mode<synchronous>, transform_indices = @transform_1, window_bounds = array<i64: 3, 8, 8>}, {pipeline_mode = #tpu.pipeline_mode<synchronous>, transform_indices = @transform_2, window_bounds = array<i64: 8, 1>}, {pipeline_mode = #tpu.pipeline_mode<synchronous>, transform_indices = @transform_3, window_bounds = array<i64: 8, 8>}, {pipeline_mode = #tpu.pipeline_mode<synchronous>, transform_indices = @transform_4, window_bounds = array<i64: 8, 1>}, {transform_indices = @transform_5, window_bounds = array<i64: 2, 8, 256>}]} {
    %0 = tpu.iota {dimensions = array<i32: 1>} : vector<1x256xi32>
    %c2_i32 = arith.constant 2 : i32
    %1 = vector.broadcast %c2_i32 : i32 to vector<1x256xi32>
    %2 = arith.cmpi sge, %0, %1 : vector<1x256xi32>
    %3 = arith.extui %2 : vector<1x256xi1> to vector<1x256xi32>
    %4 = arith.sitofp %3 : vector<1x256xi32> to vector<1x256xf32>
    %c254_i32 = arith.constant 254 : i32
    %5 = vector.broadcast %c254_i32 : i32 to vector<1x256xi32>
    %6 = arith.cmpi slt, %0, %5 : vector<1x256xi32>
    %7 = arith.extui %6 : vector<1x256xi1> to vector<1x256xi32>
    %8 = arith.sitofp %7 : vector<1x256xi32> to vector<1x256xf32>
    %c0 = arith.constant 0 : index
    %c0_0 = arith.constant 0 : index
    %c0_1 = arith.constant 0 : index
    %9 = vector.load %arg2[%c0, %c0_0, %c0_1] : memref<3x8x8xbf16, #tpu.memory_space<vmem>>, vector<1x8x8xbf16>
    %10 = vector.shape_cast %9 : vector<1x8x8xbf16> to vector<8x8xbf16>
    %c1 = arith.constant 1 : index
    %c0_2 = arith.constant 0 : index
    %c0_3 = arith.constant 0 : index
    %11 = vector.load %arg2[%c1, %c0_2, %c0_3] : memref<3x8x8xbf16, #tpu.memory_space<vmem>>, vector<1x8x8xbf16>
    %12 = vector.shape_cast %11 : vector<1x8x8xbf16> to vector<8x8xbf16>
    %c2 = arith.constant 2 : index
    %c0_4 = arith.constant 0 : index
    %c0_5 = arith.constant 0 : index
    %13 = vector.load %arg2[%c2, %c0_4, %c0_5] : memref<3x8x8xbf16, #tpu.memory_space<vmem>>, vector<1x8x8xbf16>
    %14 = vector.shape_cast %13 : vector<1x8x8xbf16> to vector<8x8xbf16>
    %c0_6 = arith.constant 0 : index
    %c0_7 = arith.constant 0 : index
    %15 = vector.load %arg3[%c0_6, %c0_7] : memref<8x1xf32, #tpu.memory_space<vmem>>, vector<8x1xf32>
    %c0_8 = arith.constant 0 : index
    %c0_9 = arith.constant 0 : index
    %16 = vector.load %arg4[%c0_8, %c0_9] : memref<8x8xbf16, #tpu.memory_space<vmem>>, vector<8x8xbf16>
    %c0_10 = arith.constant 0 : index
    %c0_11 = arith.constant 0 : index
    %17 = vector.load %arg5[%c0_10, %c0_11] : memref<8x1xf32, #tpu.memory_space<vmem>>, vector<8x1xf32>
    %c0_i32 = arith.constant 0 : i32
    %18 = arith.index_cast %c0_i32 : i32 to index
    %c0_12 = arith.constant 0 : index
    %c0_13 = arith.constant 0 : index
    %19 = vector.load %arg1[%18, %c0_12, %c0_13] : memref<2x8x256xbf16, #tpu.memory_space<vmem>>, vector<1x8x256xbf16>
    %20 = vector.shape_cast %19 : vector<1x8x256xbf16> to vector<8x256xbf16>
    %21 = arith.extf %20 : vector<8x256xbf16> to vector<8x256xf32>
    %c2_i32_14 = arith.constant 2 : i32
    %22 = tpu.dynamic_rotate %21 by %c2_i32_14 dim 1 : vector<8x256xf32>, i32 -> vector<8x256xf32>
    %23 = vector.broadcast %4 : vector<1x256xf32> to vector<8x256xf32>
    %24 = arith.mulf %22, %23 : vector<8x256xf32>
    %c254_i32_15 = arith.constant 254 : i32
    %25 = tpu.dynamic_rotate %21 by %c254_i32_15 dim 1 : vector<8x256xf32>, i32 -> vector<8x256xf32>
    %26 = vector.broadcast %8 : vector<1x256xf32> to vector<8x256xf32>
    %27 = arith.mulf %25, %26 : vector<8x256xf32>
    %28 = arith.truncf %24 : vector<8x256xf32> to vector<8x256xbf16>
    %cst = arith.constant dense<0.000000e+00> : vector<8x256xf32>
    %29 = tpu.matmul %10, %28, %cst {dimension_numbers = #tpu.dot_dimension_numbers<[1], [0], [0], [1], [0, 0, 1, 1], [], []>} : vector<8x8xbf16>, vector<8x256xbf16>, vector<8x256xf32> -> vector<8x256xf32>
    %cst_16 = arith.constant dense<0.000000e+00> : vector<8x256xf32>
    %30 = tpu.matmul %12, %20, %cst_16 {dimension_numbers = #tpu.dot_dimension_numbers<[1], [0], [0], [1], [0, 0, 1, 1], [], []>} : vector<8x8xbf16>, vector<8x256xbf16>, vector<8x256xf32> -> vector<8x256xf32>
    %31 = arith.addf %29, %30 : vector<8x256xf32>
    %32 = arith.truncf %27 : vector<8x256xf32> to vector<8x256xbf16>
    %cst_17 = arith.constant dense<0.000000e+00> : vector<8x256xf32>
    %33 = tpu.matmul %14, %32, %cst_17 {dimension_numbers = #tpu.dot_dimension_numbers<[1], [0], [0], [1], [0, 0, 1, 1], [], []>} : vector<8x8xbf16>, vector<8x256xbf16>, vector<8x256xf32> -> vector<8x256xf32>
    %34 = arith.addf %31, %33 : vector<8x256xf32>
    %35 = vector.broadcast %15 : vector<8x1xf32> to vector<8x256xf32>
    %36 = arith.addf %34, %35 : vector<8x256xf32>
    %cst_18 = arith.constant 0.000000e+00 : f32
    %37 = vector.broadcast %cst_18 : f32 to vector<8x256xf32>
    %38 = arith.maximumf %36, %37 : vector<8x256xf32>
    %39 = arith.truncf %38 : vector<8x256xf32> to vector<8x256xbf16>
    %cst_19 = arith.constant dense<0.000000e+00> : vector<8x256xf32>
    %40 = tpu.matmul %16, %39, %cst_19 {dimension_numbers = #tpu.dot_dimension_numbers<[1], [0], [0], [1], [0, 0, 1, 1], [], []>} : vector<8x8xbf16>, vector<8x256xbf16>, vector<8x256xf32> -> vector<8x256xf32>
    %41 = vector.broadcast %17 : vector<8x1xf32> to vector<8x256xf32>
    %42 = arith.addf %40, %41 : vector<8x256xf32>
    %43 = arith.addf %21, %42 : vector<8x256xf32>
    %44 = arith.truncf %43 : vector<8x256xf32> to vector<8x256xbf16>
    %45 = arith.index_cast %c0_i32 : i32 to index
    %c0_20 = arith.constant 0 : index
    %c0_21 = arith.constant 0 : index
    %46 = vector.load %arg6[%45, %c0_20, %c0_21] : memref<2x8x256xbf16, #tpu.memory_space<vmem>>, vector<1x8x256xbf16>
    %47 = vector.shape_cast %46 : vector<1x8x256xbf16> to vector<8x256xbf16>
    %48 = vector.shape_cast %44 : vector<8x256xbf16> to vector<1x8x256xbf16>
    tpu.vector_store %arg6[%45, %c0_20, %c0_21], %48 {strides = array<i32>} : memref<2x8x256xbf16, #tpu.memory_space<vmem>>, vector<1x8x256xbf16>,
    %c1_i32 = arith.constant 1 : i32
    %49 = arith.index_cast %c1_i32 : i32 to index
    %c0_22 = arith.constant 0 : index
    %c0_23 = arith.constant 0 : index
    %50 = vector.load %arg1[%49, %c0_22, %c0_23] : memref<2x8x256xbf16, #tpu.memory_space<vmem>>, vector<1x8x256xbf16>
    %51 = vector.shape_cast %50 : vector<1x8x256xbf16> to vector<8x256xbf16>
    %52 = arith.extf %51 : vector<8x256xbf16> to vector<8x256xf32>
    %c2_i32_24 = arith.constant 2 : i32
    %53 = tpu.dynamic_rotate %52 by %c2_i32_24 dim 1 : vector<8x256xf32>, i32 -> vector<8x256xf32>
    %54 = vector.broadcast %4 : vector<1x256xf32> to vector<8x256xf32>
    %55 = arith.mulf %53, %54 : vector<8x256xf32>
    %c254_i32_25 = arith.constant 254 : i32
    %56 = tpu.dynamic_rotate %52 by %c254_i32_25 dim 1 : vector<8x256xf32>, i32 -> vector<8x256xf32>
    %57 = vector.broadcast %8 : vector<1x256xf32> to vector<8x256xf32>
    %58 = arith.mulf %56, %57 : vector<8x256xf32>
    %59 = arith.truncf %55 : vector<8x256xf32> to vector<8x256xbf16>
    %cst_26 = arith.constant dense<0.000000e+00> : vector<8x256xf32>
    %60 = tpu.matmul %10, %59, %cst_26 {dimension_numbers = #tpu.dot_dimension_numbers<[1], [0], [0], [1], [0, 0, 1, 1], [], []>} : vector<8x8xbf16>, vector<8x256xbf16>, vector<8x256xf32> -> vector<8x256xf32>
    %cst_27 = arith.constant dense<0.000000e+00> : vector<8x256xf32>
    %61 = tpu.matmul %12, %51, %cst_27 {dimension_numbers = #tpu.dot_dimension_numbers<[1], [0], [0], [1], [0, 0, 1, 1], [], []>} : vector<8x8xbf16>, vector<8x256xbf16>, vector<8x256xf32> -> vector<8x256xf32>
    %62 = arith.addf %60, %61 : vector<8x256xf32>
    %63 = arith.truncf %58 : vector<8x256xf32> to vector<8x256xbf16>
    %cst_28 = arith.constant dense<0.000000e+00> : vector<8x256xf32>
    %64 = tpu.matmul %14, %63, %cst_28 {dimension_numbers = #tpu.dot_dimension_numbers<[1], [0], [0], [1], [0, 0, 1, 1], [], []>} : vector<8x8xbf16>, vector<8x256xbf16>, vector<8x256xf32> -> vector<8x256xf32>
    %65 = arith.addf %62, %64 : vector<8x256xf32>
    %66 = vector.broadcast %15 : vector<8x1xf32> to vector<8x256xf32>
    %67 = arith.addf %65, %66 : vector<8x256xf32>
    %cst_29 = arith.constant 0.000000e+00 : f32
    %68 = vector.broadcast %cst_29 : f32 to vector<8x256xf32>
    %69 = arith.maximumf %67, %68 : vector<8x256xf32>
    %70 = arith.truncf %69 : vector<8x256xf32> to vector<8x256xbf16>
    %cst_30 = arith.constant dense<0.000000e+00> : vector<8x256xf32>
    %71 = tpu.matmul %16, %70, %cst_30 {dimension_numbers = #tpu.dot_dimension_numbers<[1], [0], [0], [1], [0, 0, 1, 1], [], []>} : vector<8x8xbf16>, vector<8x256xbf16>, vector<8x256xf32> -> vector<8x256xf32>
    %72 = vector.broadcast %17 : vector<8x1xf32> to vector<8x256xf32>
    %73 = arith.addf %71, %72 : vector<8x256xf32>
    %74 = arith.addf %52, %73 : vector<8x256xf32>
    %75 = arith.truncf %74 : vector<8x256xf32> to vector<8x256xbf16>
    %76 = arith.index_cast %c1_i32 : i32 to index
    %c0_31 = arith.constant 0 : index
    %c0_32 = arith.constant 0 : index
    %77 = vector.load %arg6[%76, %c0_31, %c0_32] : memref<2x8x256xbf16, #tpu.memory_space<vmem>>, vector<1x8x256xbf16>
    %78 = vector.shape_cast %77 : vector<1x8x256xbf16> to vector<8x256xbf16>
    %79 = vector.shape_cast %75 : vector<8x256xbf16> to vector<1x8x256xbf16>
    tpu.vector_store %arg6[%76, %c0_31, %c0_32], %79 {strides = array<i32>} : memref<2x8x256xbf16, #tpu.memory_space<vmem>>, vector<1x8x256xbf16>,
    %c2_i32_33 = arith.constant 2 : i32
    return
  }
  func.func @transform_0(%arg0: i32) -> (i32, i32, i32) {
    %c0_i32 = arith.constant 0 : i32
    %c0_i32_0 = arith.constant 0 : i32
    %c0_i32_1 = arith.constant 0 : i32
    return %arg0, %c0_i32, %c0_i32_0 : i32, i32, i32
  }
  func.func @transform_1(%arg0: i32) -> (i32, i32, i32) {
    %c0_i32 = arith.constant 0 : i32
    %c0_i32_0 = arith.constant 0 : i32
    %c0_i32_1 = arith.constant 0 : i32
    %c0_i32_2 = arith.constant 0 : i32
    return %c0_i32, %c0_i32_0, %c0_i32_1 : i32, i32, i32
  }
  func.func @transform_2(%arg0: i32) -> (i32, i32) {
    %c0_i32 = arith.constant 0 : i32
    %c0_i32_0 = arith.constant 0 : i32
    %c0_i32_1 = arith.constant 0 : i32
    return %c0_i32, %c0_i32_0 : i32, i32
  }
  func.func @transform_3(%arg0: i32) -> (i32, i32) {
    %c0_i32 = arith.constant 0 : i32
    %c0_i32_0 = arith.constant 0 : i32
    %c0_i32_1 = arith.constant 0 : i32
    return %c0_i32, %c0_i32_0 : i32, i32
  }
  func.func @transform_4(%arg0: i32) -> (i32, i32) {
    %c0_i32 = arith.constant 0 : i32
    %c0_i32_0 = arith.constant 0 : i32
    %c0_i32_1 = arith.constant 0 : i32
    return %c0_i32, %c0_i32_0 : i32, i32
  }
  func.func @transform_5(%arg0: i32) -> (i32, i32, i32) {
    %c0_i32 = arith.constant 0 : i32
    %c0_i32_0 = arith.constant 0 : i32
    %c0_i32_1 = arith.constant 0 : i32
    return %arg0, %c0_i32, %c0_i32_0 : i32, i32, i32
  }
}

</mosaic_0001>

<bundles_post_ra>
// kernel: tpu_custom_call.1
= control target key start
LH: loop header
LB: loop body
LE: loop exit
PB: predicated region body
PF: predicated region fallthrough
CT: control target
= control target key end

     0   :  { %10 = vsyncpa [#allocation3], 0  ;;  %s756_s0 = inlined_call_operand.vmem [shape: bf16[2,8,256], index: 0, kind: input, shape index: {}]   ;;  %s757_s1 = inlined_call_operand.hbm [shape: bf16[3,8,8], index: 1, kind: input, shape index: {}]   ;;  %s758_s2 = inlined_call_operand.vmem [shape: f32[8,1], index: 2, kind: input, shape index: {}]   ;;  %s759_s3 = inlined_call_operand.hbm [shape: bf16[8,8], index: 3, kind: input, shape index: {}]   ;;  %s760_s4 = inlined_call_operand.vmem [shape: f32[8,1], index: 4, kind: input, shape index: {}]   ;;  %s761_s5 = inlined_call_operand.hbm [shape: bf16[2,8,256], index: 5, kind: output, shape index: {}]  }
   0x1   :  { %11 = vsyncpa [#allocation6], 0 }
   0x2   :  { %12 = vsyncpa [#allocation4], 0  ;;  %s19_s20 = sshll.u32 %s757_s1, 4  ;;  %s590_s21 = smov [#allocation2]   ;;  %s20_s20 = int_to_ptr.hbm [resolvable:$true] %s19_s20 }
   0x3   :  { %s21_s22 = sshll.u32 %s590_s21, 4  ;;  %s35_s25 = sshll.u32 %s759_s3, 4  ;;  %s22_s22 = int_to_ptr.vmem [resolvable:$true] %s21_s22  ;;  %s36_s25 = int_to_ptr.hbm [resolvable:$true] %s35_s25 }
   0x4   :  { %s591_s26 = smov 64   ;;  %s592_s27 = smov 4  }
   0x5   :  { %27 = dma.hbm_to_vmem [thread:$0]  %s20_s20, 192, %s22_s22, [#allocation3], %s591_s26, %s591_s26, %s592_s27  }
   0x6   :  { %s593_s28 = smov [#allocation5]  }
   0x7   :  { %s37_s29 = sshll.u32 %s593_s28, 4  ;;  %s38_s29 = int_to_ptr.vmem [resolvable:$true] %s37_s29 }
   0x8   :  { %40 = dma.hbm_to_vmem [thread:$0]  %s36_s25, 64, %s38_s29, [#allocation6]  }
   0x9   :  { %584 = dma.done.wait [#allocation3], 192  }
   0xa   :  { %585 = vsyncadd [#allocation3], 4294967104 }
   0xb   :  { %586 = dma.done.wait [#allocation6], 64  }
   0xc   :  { %587 = vsyncadd [#allocation6], 4294967232  ;;  %v640_v0 = vld [vmem:[%s756_s0] sm:$0xff]  ;;  %vm107_vm0 = vcmask 1043456   ;;  %s594_s3 = smov 2   ;;  %vm103_vm1 = vcmask 64512   ;;  %v52_v16 = vlaneseq }
   0xd   :  { %v76_v1 = vunpack.c.l.bf16 %v640_v0  ;;  %v77_v2 = vunpack.c.h.bf16 %v640_v0  ;;  %v99_v3 = vunpack.c.l.b16 %v640_v0  ;;  %v100_v4 = vunpack.c.h.b16 %v640_v0  ;;  %v652_v10 = vld [vmem:[#allocation2 + $0x4] sm:$0xf]  ;;  %s595_s6 = smov 126   ;;  %v664_v12 = vld [vmem:[%s756_s0 + $0x8] sm:$0xff]  ;;  %v685_v31 = vld [vmem:[#allocation2] sm:$0xf] }
   0xe   :  { %v72_v11 = vld [vmem:[%s758_s2] sm:$0xff]  ;;  %v596_v13 = vmov 0   ;;  %v271_v14 = vunpack.c.l.bf16 %v664_v12  ;;  %v272_v15 = vunpack.c.h.bf16 %v664_v12  ;;  %v672_v18 = vand.u32 127, %v52_v16  ;;  %v71_v43 = vld [vmem:[#allocation2 + $0x8] sm:$0xf]  ;;  %s445_s14 = sshll.u32 %s761_s5, 4  ;;  %s446_s14 = int_to_ptr.hbm [resolvable:$true] %s445_s14 }
   0xf   :  { %v489_v5 = vpack.i.bf16 %v77_v2, %v76_v1  ;;  %v101_v6 = vpack.c.b16 %v99_v3, %v99_v3  ;;  %v102_v7 = vpack.c.b16 %v100_v4, %v100_v4  ;;  %499 = vset.pattern.permute.xlu1 %v596_v13  ;;  %510 = vset.pattern.permute.xlu2 %v596_v13  ;;  %v597_v22 = vmov 0.0   ;;  %s599_s15 = smov 128   ;;  %s600_s16 = smov 8  }
  0x10   :  { %216 = vperm.xlu1 %499, %v72_v11   ;;  %511 = vset.pattern.permute.xlu0 %v596_v13  ;;  %v505_v17 = vpack.i.bf16 %v272_v15, %v271_v14  ;;  %vm55_vm2 = vcmp.ge.s32.totalorder %v672_v18, 2  ;;  %vm82_vm3 = vcmp.lt.s32.totalorder %v672_v18, 2  ;;  %v54_v24 = vadd.s32 128, %v672_v18 }
  0x11   :  { %490 = vrot.lane.b32.xlu0 %v489_v5, %s594_s3  ;;  %v109_v8 = vsel %vm107_vm0, %v101_v6, 0  ;;  %v112_v9 = vsel %vm107_vm0, %v102_v7, 0  ;;  %v676_v23 = vsel %vm55_vm2, 1.0, %v597_v22  ;;  %vm91_vm5 = vcmp.lt.s32.totalorder %v672_v18, 126 }
  0x12   :  { %121 = vmatpush.bf16.msra.mxu0 %v109_v8  ;;  %134 = vmatpush.bf16.msra.mxu1 %v112_v9  ;;  %vm62_vm4 = vcmp.lt.s32.totalorder %v54_v24, 254  ;;  %v292_v49 = vunpack.c.l.b16 %v664_v12  ;;  %v293_v50 = vunpack.c.h.b16 %v664_v12 }
  0x13   :  { %506 = vrot.lane.b32.xlu2 %v505_v17, %s595_s6  ;;  %v460_v36 = vsel %vm62_vm4, 1.0, %v597_v22 }
  0x14   :  { %v294_v51 = vpack.c.b16 %v292_v49, %v292_v49  ;;  %v295_v52 = vpack.c.b16 %v293_v50, %v293_v50 }
  0x15   :  { %461 = vmatmul.msk.bf16.vlgmr.msra.gmra.mxu0 %vm103_vm1, %v652_v10  ;;  %462 = vmatmul.msk.bf16.vlgmr.msra.gmra.mxu1 %vm103_vm1, %v652_v10 }
  0x16   :  { %v297_v53 = vsel %vm107_vm0, %v294_v51, 0  ;;  %v300_v54 = vsel %vm107_vm0, %v295_v52, 0 }
  0x18   :  { %501 = vrot.lane.b32.xlu1 %v505_v17, %s594_s3 }
  0x19   :  { %495 = vrot.lane.b32.xlu0 %v489_v5, %s595_s6 }
  0x6d   :  { %v507_v55 = vpop.permute.xlu2 %506 }
  0x6e   :  { %v509_v57 = vunpack.i.h.bf16 %v507_v55  ;;  %v508_v58 = vunpack.i.l.bf16 %v507_v55 }
  0x70   :  { %v286_v59 = vsel %vm91_vm5, %v509_v57, %v508_v58  ;;  %v285_v60 = vsel %vm91_vm5, %v508_v58, %v509_v57 }
  0x71   :  { %v360_v61 = vpack.c.bf16 %v285_v60, %v285_v60  ;;  %v288_v62 = vmul.f32 %v460_v36, %v286_v59 }
  0x73   :  { %v363_v63 = vsel %vm107_vm0, %v360_v61, 0  ;;  %v361_v3 = vpack.c.bf16 %v288_v62, %v288_v62 }
  0x75   :  { %v366_v4 = vsel %vm107_vm0, %v361_v3, 0 }
  0x82   :  { %v709_v56 = vpop.permute.xlu1 %216 }
  0x83   :  { %v491_v19 = vpop.permute.xlu0 %490 }
  0x84   :  { %v493_v20 = vunpack.i.h.bf16 %v491_v19  ;;  %v492_v21 = vunpack.i.l.bf16 %v491_v19 }
  0x86   :  { %v83_v25 = vsel %vm82_vm3, %v492_v21, %v493_v20  ;;  %v84_v26 = vsel %vm82_vm3, %v493_v20, %v492_v21 }
  0x87   :  { %v97_v27 = vpack.c.bf16 %v83_v25, %v83_v25  ;;  %v85_v28 = vmul.f32 %v676_v23, %v84_v26 }
  0x89   :  { %v147_v29 = vsel %vm107_vm0, %v97_v27, 0  ;;  %v96_v30 = vpack.c.bf16 %v85_v28, %v85_v28 }
  0x8a   :  { %169 = vmatpush.bf16.msra.mxu3 %v147_v29  ;;  %v502_v5 = vpop.permute.xlu1 %501 }
  0x8b   :  { %v496_v32 = vpop.permute.xlu0 %495  ;;  %v144_v33 = vsel %vm107_vm0, %v96_v30, 0  ;;  %v504_v6 = vunpack.i.h.bf16 %v502_v5  ;;  %v503_v7 = vunpack.i.l.bf16 %v502_v5 }
  0x8c   :  { %v498_v34 = vunpack.i.h.bf16 %v496_v32  ;;  %v497_v35 = vunpack.i.l.bf16 %v496_v32  ;;  %156 = vmatpush.bf16.msra.mxu2 %v144_v33 }
  0x8d   :  { %464 = vmatmul.msk.bf16.vlgmr.msra.gmra.mxu3 %vm103_vm1, %v685_v31  ;;  %v278_v9 = vsel %vm82_vm3, %v504_v6, %v503_v7  ;;  %v277_v24 = vsel %vm82_vm3, %v503_v7, %v504_v6 }
  0x8e   :  { %v92_v37 = vsel %vm91_vm5, %v497_v35, %v498_v34  ;;  %v93_v38 = vsel %vm91_vm5, %v498_v34, %v497_v35  ;;  %v279_v20 = vmul.f32 %v676_v23, %v278_v9  ;;  %v290_v28 = vpack.c.bf16 %v277_v24, %v277_v24 }
  0x8f   :  { %463 = vmatmul.msk.bf16.vlgmr.msra.gmra.mxu2 %vm103_vm1, %v685_v31  ;;  %v175_v39 = vpack.c.bf16 %v92_v37, %v92_v37  ;;  %v95_v40 = vmul.f32 %v460_v36, %v93_v38 }
  0x90   :  { %v289_v29 = vpack.c.bf16 %v279_v20, %v279_v20  ;;  %v332_v23 = vsel %vm107_vm0, %v290_v28, 0 }
  0x91   :  { %v181_v41 = vsel %vm107_vm0, %v175_v39, 0  ;;  %v176_v42 = vpack.c.bf16 %v95_v40, %v95_v40  ;;  %v73_v40 = vld [vmem:[#allocation5] sm:$0xf] }
  0x92   :  { %193 = vmatpush.bf16.msrb.mxu0 %v181_v41  ;;  %v123_v44 = vpop.f32.mrf.mxu0  ;;  %v136_v45 = vpop.f32.mrf.mxu1  ;;  %v329_v38 = vsel %vm107_vm0, %v289_v29, 0 }
  0x93   :  { %v184_v46 = vsel %vm107_vm0, %v176_v42, 0 }
  0x94   :  { %206 = vmatpush.bf16.msrb.mxu1 %v184_v46 }
  0x95   :  { %465 = vmatmul.msk.bf16.vlgmr.msrb.gmra.mxu0 %vm103_vm1, %v71_v43 }
  0x96   :  { %309 = vmatpush.bf16.msra.mxu0 %v297_v53 }
  0x97   :  { %466 = vmatmul.msk.bf16.vlgmr.msrb.gmra.mxu1 %vm103_vm1, %v71_v43 }
  0x98   :  { %322 = vmatpush.bf16.msra.mxu1 %v300_v54 }
  0x9a   :  { %v125_v47 = vpop.f32.mrf.mxu0  ;;  %v138_v48 = vpop.f32.mrf.mxu1  ;;  %375 = vmatpush.bf16.msrb.mxu0 %v363_v63 }
  0x9c   :  { %388 = vmatpush.bf16.msrb.mxu1 %v366_v4 }
  0xa5   :  { %470 = vmatmul.msk.bf16.vlgmr.msra.gmra.mxu0 %vm103_vm1, %v652_v10 }
  0xa7   :  { %471 = vmatmul.msk.bf16.vlgmr.msra.gmra.mxu1 %vm103_vm1, %v652_v10  ;;  %v74_v10 = vld [vmem:[%s760_s4] sm:$0xff]  ;;  %s598_s4 = smov [#allocation7]  }
  0xa8   :  { %227 = vperm.xlu2 %510, %v74_v10   ;;  %s443_s11 = sshll.u32 %s598_s4, 4  ;;  %s444_s11 = int_to_ptr.vmem [resolvable:$true] %s443_s11 }
  0xb5   :  { %474 = vmatmul.msk.bf16.vlgmr.msrb.gmra.mxu0 %vm103_vm1, %v71_v43 }
  0xb7   :  { %475 = vmatmul.msk.bf16.vlgmr.msrb.gmra.mxu1 %vm103_vm1, %v71_v43 }
 0x102   :  { %v228_v49 = vpop.permute.xlu2 %227 }
 0x110   :  { %v171_v8 = vpop.f32.mrf.mxu3 }
 0x111   :  { %v172_v16 = vadd.f32 %v171_v8, %v136_v45 }
 0x112   :  { %v158_v11 = vpop.f32.mrf.mxu2  ;;  %v195_v13 = vpop.f32.mrf.mxu0 }
 0x113   :  { %v159_v17 = vadd.f32 %v158_v11, %v123_v44 }
 0x114   :  { %v208_v19 = vpop.f32.mrf.mxu1 }
 0x115   :  { %v212_v21 = vadd.f32 %v195_v13, %v159_v17  ;;  %v213_v22 = vadd.f32 %v208_v19, %v172_v16 }
 0x117   :  { %v219_v25 = vadd.f32 %v709_v56, %v212_v21  ;;  %v220_v26 = vadd.f32 %v709_v56, %v213_v22 }
 0x118   :  { %v173_v27 = vpop.f32.mrf.mxu3 }
 0x119   :  { %v221_v30 = vmax.f32 %v219_v25, 0.0  ;;  %v222_v32 = vmax.f32 %v220_v26, 0.0 }
 0x11a   :  { %v160_v33 = vpop.f32.mrf.mxu2  ;;  %v197_v34 = vpop.f32.mrf.mxu0 }
 0x11b   :  { %v223_v35 = vpack.c.bf16 %v221_v30, %v221_v30  ;;  %v224_v36 = vpack.c.bf16 %v222_v32, %v222_v32 }
 0x11c   :  { %v210_v37 = vpop.f32.mrf.mxu1 }
 0x11d   :  { %v234_v18 = vsel %vm107_vm0, %v223_v35, 0  ;;  %v237_v39 = vsel %vm107_vm0, %v224_v36, 0 }
 0x11e   :  { %246 = vmatpush.bf16.msrb.mxu2 %v234_v18  ;;  %259 = vmatpush.bf16.msrb.mxu3 %v237_v39 }
 0x121   :  { %467 = vmatmul.msk.bf16.vlgmr.msrb.gmra.mxu2 %vm103_vm1, %v73_v40  ;;  %468 = vmatmul.msk.bf16.vlgmr.msrb.gmra.mxu3 %vm103_vm1, %v73_v40 }
 0x122   :  { %354 = vmatpush.bf16.msra.mxu3 %v332_v23  ;;  %341 = vmatpush.bf16.msra.mxu2 %v329_v38  ;;  %v311_v41 = vpop.f32.mrf.mxu0 }
 0x124   :  { %v324_v42 = vpop.f32.mrf.mxu1 }
 0x12a   :  { %v313_v43 = vpop.f32.mrf.mxu0 }
 0x12c   :  { %v326_v44 = vpop.f32.mrf.mxu1 }
 0x131   :  { %472 = vmatmul.msk.bf16.vlgmr.msra.gmra.mxu2 %vm103_vm1, %v685_v31  ;;  %473 = vmatmul.msk.bf16.vlgmr.msra.gmra.mxu3 %vm103_vm1, %v685_v31 }
 0x132   :  { %v377_v45 = vpop.f32.mrf.mxu0 }
 0x134   :  { %v390_v46 = vpop.f32.mrf.mxu1 }
 0x13a   :  { %v379_v47 = vpop.f32.mrf.mxu0 }
 0x13c   :  { %v392_v48 = vpop.f32.mrf.mxu1 }
 0x1a4   :  { %v248_v50 = vpop.f32.mrf.mxu2  ;;  %v261_v51 = vpop.f32.mrf.mxu3 }
 0x1a5   :  { %v249_v52 = vadd.f32 %v248_v50, %v228_v49  ;;  %v262_v53 = vadd.f32 %v261_v51, %v228_v49 }
 0x1a7   :  { %v265_v54 = vadd.f32 %v249_v52, %v76_v1  ;;  %v266_v55 = vadd.f32 %v262_v53, %v77_v2 }
 0x1a9   :  { %v267_v31 = vpack.c.bf16 %v266_v55, %v265_v54 }
 0x1ab   :  { %268 = vst [vmem:[#allocation7] sm:$0xff] %v267_v31 }
 0x1ac   :  { %v250_v57 = vpop.f32.mrf.mxu2  ;;  %v263_v58 = vpop.f32.mrf.mxu3 }
 0x1b4   :  { %v343_v59 = vpop.f32.mrf.mxu2  ;;  %v356_v60 = vpop.f32.mrf.mxu3 }
 0x1b5   :  { %v344_v61 = vadd.f32 %v343_v59, %v311_v41  ;;  %v357_v62 = vadd.f32 %v356_v60, %v324_v42 }
 0x1b7   :  { %v394_v63 = vadd.f32 %v377_v45, %v344_v61  ;;  %v395_v3 = vadd.f32 %v390_v46, %v357_v62 }
 0x1b9   :  { %v396_v4 = vadd.f32 %v394_v63, %v709_v56  ;;  %v397_v5 = vadd.f32 %v395_v3, %v709_v56 }
 0x1bb   :  { %v398_v6 = vmax.f32 %v396_v4, 0.0  ;;  %v399_v7 = vmax.f32 %v397_v5, 0.0 }
 0x1bc   :  { %v345_v1 = vpop.f32.mrf.mxu2  ;;  %v358_v8 = vpop.f32.mrf.mxu3 }
 0x1bd   :  { %v400_v0 = vpack.c.bf16 %v398_v6, %v398_v6  ;;  %v401_v2 = vpack.c.bf16 %v399_v7, %v399_v7 }
 0x1bf   :  { %v403_v9 = vsel %vm107_vm0, %v400_v0, 0  ;;  %v406_v10 = vsel %vm107_vm0, %v401_v2, 0 }
 0x1c0   :  { %415 = vmatpush.bf16.msrb.mxu2 %v403_v9  ;;  %428 = vmatpush.bf16.msrb.mxu3 %v406_v10 }
 0x1c3   :  { %476 = vmatmul.msk.bf16.vlgmr.msrb.gmra.mxu2 %vm103_vm1, %v73_v40  ;;  %477 = vmatmul.msk.bf16.vlgmr.msrb.gmra.mxu3 %vm103_vm1, %v73_v40 }
 0x246   :  { %v417_v11 = vpop.f32.mrf.mxu2  ;;  %v430_v13 = vpop.f32.mrf.mxu3 }
 0x247   :  { %v418_v16 = vadd.f32 %v417_v11, %v228_v49  ;;  %v431_v56 = vadd.f32 %v430_v13, %v228_v49 }
 0x249   :  { %v434_v17 = vadd.f32 %v418_v16, %v271_v14  ;;  %v435_v19 = vadd.f32 %v431_v56, %v272_v15 }
 0x24b   :  { %v436_v20 = vpack.c.bf16 %v435_v19, %v434_v17 }
 0x24d   :  { %438 = vst [vmem:[#allocation7 + $0x8] sm:$0xff] %v436_v20 }
 0x24e   :  { %v419_v21 = vpop.f32.mrf.mxu2  ;;  %v432_v22 = vpop.f32.mrf.mxu3  ;;  %451 = dma.vmem_to_hbm [thread:$0]  %s444_s11, 256, %s446_s14, [#allocation4], %s599_s15, %s599_s15, %s600_s16  }
 0x24f   :  { %588 = dma.done.wait [#allocation4], 256  }
 0x250   :  { %589 = vsyncadd [#allocation4], 4294967040 }
 0x251   :  { %456 = vsyncpa [#allocation3], 1 }
 0x252   :  { %457 = vsyncpa [#allocation6], 1 }
 0x253   :  { %458 = vsyncpa [#allocation4], 1 }

</bundles_post_ra>
